<compile_context>
chip_gen: v7x
topology: tpu7x:2x2x1
jax: 0.10.0
libtpu: 0.0.40
codegen_flags: <defaults>
</compile_context>

<pallas_src>
import jax
import jax.numpy as jnp
from jax.experimental import pallas as pl
from jax.experimental.pallas import tpu as pltpu


def _round_up(n, m):
    return ((n + m - 1) // m) * m


# ---------------------------------------------------------------------------
# Fused CFG kernel:
#   out = ((x @ W + bias) + t*wt + cond @ (s*Wc)) * mask
# one grid step per batch tile of TB batches; the main matmul runs as a single
# lane-dense (TB*T, D) @ (D, D) slab on the MXU.
# ---------------------------------------------------------------------------
def _make_cfg_kernel(has_cond):

    def _core(x_ref, mask_ref, w_ref, add_b, o_ref):
        TB, T, D = x_ref.shape
        # Flatten the batch tile into one lane-dense slab; T is padded to the sublane
        # multiple in the wrapper so this reshape is a zero-cost view.
        x2 = x_ref[...].reshape(TB * T, D)
        h = jnp.dot(x2, w_ref[...],
                    preferred_element_type=jnp.float32).reshape(TB, T, D)
        o_ref[...] = ((h + add_b[:, None, :]) * mask_ref[...]).astype(o_ref.dtype)

    if has_cond:
        def kernel(x_ref, t_ref, cond_ref, mask_ref,
                   w_ref, bias_ref, wt_ref, wcs_ref, o_ref):
            # Per-batch additive term: bias + t*wt + cond @ (s*Wc); cfg_scale is
            # folded into Wc in the wrapper (weights are static across calls).
            condproj = jnp.dot(cond_ref[...], wcs_ref[...],
                               preferred_element_type=jnp.float32)      # (TB, D)
            add_b = bias_ref[...] + t_ref[...] * wt_ref[...] + condproj
            _core(x_ref, mask_ref, w_ref, add_b, o_ref)
    else:
        def kernel(x_ref, t_ref, mask_ref, w_ref, bias_ref, wt_ref, o_ref):
            add_b = bias_ref[...] + t_ref[...] * wt_ref[...]
            _core(x_ref, mask_ref, w_ref, add_b, o_ref)

    return kernel


def _pick_batch_tile(B, T_pad, D_pad, itemsize):
    """Batch rows (TB) per grid step.

    Targets 2048 flattened rows of the (TB*T_pad, D_pad) slab (mem-bound roofline:
    >=1024 rows reach ~86% of HBM BW; ~0.35us per-step overhead amortized), capped so
    the double-buffered x+out blocks stay under ~24 MiB (v7x's 32 MiB scoped-VMEM
    default with headroom). TB is a multiple of 8 (or the full padded batch) so the
    f32 (TB, C)/(TB, 1) per-batch operand blocks satisfy the (8, 128) sublane rule.
    """
    TARGET_ROWS = 2048
    VMEM_BLOCK_BUDGET = 24 << 20                     # x + out, double-buffered
    rows_cap = max(T_pad, VMEM_BLOCK_BUDGET // (4 * D_pad * itemsize))
    rows = min(TARGET_ROWS, rows_cap)
    TB = max(1, rows // T_pad)
    if TB >= B:
        TB = B
        # v7x has 2 TensorCores; give the "parallel" batch axis >=2 grid steps when
        # each half keeps >=512 flattened rows and stays sublane-aligned.
        half = B // 2
        if B % 2 == 0 and half % 8 == 0 and half * T_pad >= 512:
            TB = half
    else:
        TB = max(8, (TB // 8) * 8)
    return TB


# ---------------------------------------------------------------------------
# ClassifierFreeSampleModel.forward (fused single pass)
# ---------------------------------------------------------------------------
def classifier_free_sample(x, timesteps, cond, mask, params, cfg_scale,
                           class_num=None, io_dtype=None):
    # class_num accepted for signature parity; synthetic inner model ignores it.
    # TODO(synk): class_num conditioning has no equivalent in the synthetic denoiser.
    W, bias, wt, Wc = params
    B, T, D = x.shape

    out_dtype = jnp.dtype(io_dtype) if io_dtype is not None else x.dtype
    itemsize = jnp.dtype(out_dtype).itemsize

    # --- HBM-boundary dtype (mem-bound kernel: bf16 I/O halves x-read/out-write) ---
    x = x.astype(out_dtype)
    W = W.astype(out_dtype)
    bias = bias.astype(jnp.float32)
    wt = wt.astype(jnp.float32)
    Wcs = (float(cfg_scale) * Wc).astype(jnp.float32)   # cfg_scale folded into Wc

    # --- padding to hardware-friendly extents ---
    lane = 128
    sub = 32 // itemsize                 # sublane multiple: 8 for f32, 16 for bf16
    T_pad = _round_up(T, sub)
    D_pad = _round_up(D, lane)

    TB = _pick_batch_tile(B, T_pad, D_pad, itemsize)
    B_pad = _round_up(B, TB)

    pad_b, pad_t, pad_d = B_pad - B, T_pad - T, D_pad - D
    if pad_b or pad_t or pad_d:
        x = jnp.pad(x, ((0, pad_b), (0, pad_t), (0, pad_d)))
    if pad_d:
        W = jnp.pad(W, ((0, pad_d), (0, pad_d)))
        bias = jnp.pad(bias, (0, pad_d))
        wt = jnp.pad(wt, (0, pad_d))
        Wcs = jnp.pad(Wcs, ((0, 0), (0, pad_d)))

    # timesteps kept in f32: exact for diffusion step indices < 2**24.
    t2 = timesteps.astype(jnp.float32).reshape(B, 1)
    if mask is None:
        mask = jnp.ones((B, T), dtype=jnp.float32)
    mask3 = mask.astype(jnp.float32).reshape(B, T, 1)
    if pad_b or pad_t:
        t2 = jnp.pad(t2, ((0, pad_b), (0, 0)))
        mask3 = jnp.pad(mask3, ((0, pad_b), (0, pad_t), (0, 0)))

    has_cond = cond is not None
    if has_cond:
        C = cond.shape[1]
        cond_f = cond.astype(jnp.float32)
        if pad_b:
            cond_f = jnp.pad(cond_f, ((0, pad_b), (0, 0)))

    grid = (B_pad // TB,)

    x_spec = pl.BlockSpec((TB, T_pad, D_pad), lambda i: (i, 0, 0))
    t_spec = pl.BlockSpec((TB, 1), lambda i: (i, 0))
    mask_spec = pl.BlockSpec((TB, T_pad, 1), lambda i: (i, 0, 0))
    w_spec = pl.BlockSpec((D_pad, D_pad), lambda i: (0, 0))     # resident weights
    vec_spec = pl.BlockSpec((1, D_pad), lambda i: (0, 0))
    out_spec = pl.BlockSpec((TB, T_pad, D_pad), lambda i: (i, 0, 0))

    if has_cond:
        in_specs = [x_spec, t_spec,
                    pl.BlockSpec((TB, C), lambda i: (i, 0)),
                    mask_spec, w_spec, vec_spec, vec_spec,
                    pl.BlockSpec((C, D_pad), lambda i: (0, 0))]
        args = (x, t2, cond_f, mask3, W,
                bias.reshape(1, D_pad), wt.reshape(1, D_pad), Wcs)
    else:
        in_specs = [x_spec, t_spec, mask_spec, w_spec, vec_spec, vec_spec]
        args = (x, t2, mask3, W, bias.reshape(1, D_pad), wt.reshape(1, D_pad))

    # Explicit VMEM budget (double-buffered x/out blocks + resident weights + slack).
    vmem_bytes = 4 * TB * T_pad * D_pad * itemsize          # x + out, 2 buffers each
    vmem_bytes += 2 * D_pad * D_pad * itemsize              # W
    vmem_bytes += 4 * TB * T_pad * 4                        # mask blocks
    vmem_bytes += 4 << 20                                   # small operands + slack
    vmem_limit = int(min(64 << 20, max(32 << 20, vmem_bytes)))

    out = pl.pallas_call(
        _make_cfg_kernel(has_cond),
        out_shape=jax.ShapeDtypeStruct((B_pad, T_pad, D_pad), out_dtype),
        grid=grid,
        in_specs=in_specs,
        out_specs=out_spec,
        compiler_params=pltpu.CompilerParams(
            dimension_semantics=("parallel",),               # independent batch tiles
            vmem_limit_bytes=vmem_limit),
    )(*args)

    if pad_b or pad_t or pad_d:
        out = out[:B, :T, :D]
    return out


# ---------------------------------------------------------------------------
# Pure-JAX reference: EXACT two-branch ClassifierFreeSampleModel semantics
# (concat, run synthetic model on 2B, split, s-mix) to verify the fusion.
# ---------------------------------------------------------------------------
def _synthetic_model(x, t, cond, mask, params):
    W, bias, wt, Wc = params
    out = (jnp.einsum('btd,de->bte', x, W)
           + bias[None, None, :]
           + t.astype(jnp.float32)[:, None, None] * wt[None, None, :])
    if cond is not None:
        out = out + jnp.einsum('bc,cd->bd', cond, Wc)[:, None, :]
    if mask is not None:
        out = out * mask[:, :, None]
    return out


def _reference(x, timesteps, cond, mask, params, s):
    B = x.shape[0]
    xc = jnp.concatenate([x, x], 0)
    tc = jnp.concatenate([timesteps, timesteps], 0)
    cc = None if cond is None else jnp.concatenate([cond, jnp.zeros_like(cond)], 0)
    mc = None if mask is None else jnp.concatenate([mask, mask], 0)
    out = _synthetic_model(xc, tc, cc, mc, params)
    return s * out[:B] + (1.0 - s) * out[B:]


if __name__ == "__main__":
    B, T, D, C = 2, 8, 128, 64          # D = 128 -> lane-dense blocks and stores
    cfg_scale = 3.5

    key = jax.random.PRNGKey(0)
    k_x, k_c, k_t, k_w, k_b, k_wt, k_wc = jax.random.split(key, 7)

    x = jax.random.normal(k_x, (B, T, D), dtype=jnp.float32)
    cond = jax.random.normal(k_c, (B, C), dtype=jnp.float32)
    timesteps = jax.random.randint(k_t, (B,), 0, 1000).astype(jnp.float32)
    mask = jnp.ones((B, T), dtype=jnp.float32)

    # Deterministic synthetic inner-model parameters.
    W = jax.random.normal(k_w, (D, D), dtype=jnp.float32) * 0.1
    bias = jax.random.normal(k_b, (D,), dtype=jnp.float32) * 0.1
    wt = jax.random.normal(k_wt, (D,), dtype=jnp.float32) * 0.01
    Wc = jax.random.normal(k_wc, (C, D), dtype=jnp.float32) * 0.1
    params = (W, bias, wt, Wc)

    ref = _reference(x, timesteps, cond, mask, params, cfg_scale)

    # 1) f32 fused kernel vs exact two-branch reference.
    out = jax.block_until_ready(
        classifier_free_sample(x, timesteps, cond, mask, params, cfg_scale))
    assert out.shape == (B, T, D) and out.dtype == x.dtype
    assert jnp.allclose(out, ref, atol=1e-3, rtol=1e-3), \
        float(jnp.max(jnp.abs(out - ref)))

    # 2) bf16 I/O path (halves x-read / out-write HBM traffic; f32 accumulate).
    out_bf16 = jax.block_until_ready(
        classifier_free_sample(x, timesteps, cond, mask, params, cfg_scale,
                               io_dtype=jnp.bfloat16))
    assert out_bf16.shape == (B, T, D) and out_bf16.dtype == jnp.bfloat16
    assert jnp.allclose(out_bf16.astype(jnp.float32), ref, atol=0.5, rtol=5e-2), \
        float(jnp.max(jnp.abs(out_bf16.astype(jnp.float32) - ref)))

    # 3) cond=None path (skips the cond projection entirely; cfg == plain forward).
    ref_nc = _reference(x, timesteps, None, mask, params, cfg_scale)
    out_nc = jax.block_until_ready(
        classifier_free_sample(x, timesteps, None, mask, params, cfg_scale))
    assert jnp.allclose(out_nc, ref_nc, atol=1e-3, rtol=1e-3), \
        float(jnp.max(jnp.abs(out_nc - ref_nc)))

    print("KERNEL_OK")
</pallas_src>

<mosaic_0001>
module attributes {stable_mosaic.version = 11 : i64} {
  func.func @kernel(%arg0: i32, %arg1: memref<2x8x128xf32, #tpu.memory_space<vmem>>, %arg2: memref<2x1xf32, #tpu.memory_space<vmem>>, %arg3: memref<2x64xf32, #tpu.memory_space<vmem>>, %arg4: memref<2x8x1xf32, #tpu.memory_space<vmem>>, %arg5: memref<128x128xf32, #tpu.memory_space<vmem>>, %arg6: memref<1x128xf32, #tpu.memory_space<vmem>>, %arg7: memref<1x128xf32, #tpu.memory_space<vmem>>, %arg8: memref<64x128xf32, #tpu.memory_space<vmem>>, %arg9: memref<2x8x128xf32, #tpu.memory_space<vmem>>) attributes {dimension_semantics = [#tpu.dimension_semantics<parallel>], iteration_bounds = array<i64: 1>, scalar_prefetch = 0 : i64, scratch_operands = 0 : i64, tpu.core_type = #tpu.core_type<tc>, window_params = [{transform_indices = @transform_0, window_bounds = array<i64: 2, 8, 128>}, {transform_indices = @transform_1, window_bounds = array<i64: 2, 1>}, {transform_indices = @transform_2, window_bounds = array<i64: 2, 64>}, {transform_indices = @transform_3, window_bounds = array<i64: 2, 8, 1>}, {pipeline_mode = #tpu.pipeline_mode<synchronous>, transform_indices = @transform_4, window_bounds = array<i64: 128, 128>}, {pipeline_mode = #tpu.pipeline_mode<synchronous>, transform_indices = @transform_5, window_bounds = array<i64: 1, 128>}, {pipeline_mode = #tpu.pipeline_mode<synchronous>, transform_indices = @transform_6, window_bounds = array<i64: 1, 128>}, {pipeline_mode = #tpu.pipeline_mode<synchronous>, transform_indices = @transform_7, window_bounds = array<i64: 64, 128>}, {transform_indices = @transform_8, window_bounds = array<i64: 2, 8, 128>}]} {
    %c0 = arith.constant 0 : index
    %c0_0 = arith.constant 0 : index
    %0 = vector.load %arg3[%c0, %c0_0] : memref<2x64xf32, #tpu.memory_space<vmem>>, vector<2x64xf32>
    %c0_1 = arith.constant 0 : index
    %c0_2 = arith.constant 0 : index
    %1 = vector.load %arg8[%c0_1, %c0_2] : memref<64x128xf32, #tpu.memory_space<vmem>>, vector<64x128xf32>
    %cst = arith.constant dense<0.000000e+00> : vector<2x128xf32>
    %2 = tpu.matmul %0, %1, %cst {dimension_numbers = #tpu.dot_dimension_numbers<[1], [0], [0], [1], [0, 0, 1, 1], [], []>} : vector<2x64xf32>, vector<64x128xf32>, vector<2x128xf32> -> vector<2x128xf32>
    %c0_3 = arith.constant 0 : index
    %c0_4 = arith.constant 0 : index
    %3 = vector.load %arg6[%c0_3, %c0_4] : memref<1x128xf32, #tpu.memory_space<vmem>>, vector<1x128xf32>
    %c0_5 = arith.constant 0 : index
    %c0_6 = arith.constant 0 : index
    %4 = vector.load %arg2[%c0_5, %c0_6] : memref<2x1xf32, #tpu.memory_space<vmem>>, vector<2x1xf32>
    %c0_7 = arith.constant 0 : index
    %c0_8 = arith.constant 0 : index
    %5 = vector.load %arg7[%c0_7, %c0_8] : memref<1x128xf32, #tpu.memory_space<vmem>>, vector<1x128xf32>
    %6 = vector.broadcast %4 : vector<2x1xf32> to vector<2x128xf32>
    %7 = vector.broadcast %5 : vector<1x128xf32> to vector<2x128xf32>
    %8 = arith.mulf %6, %7 : vector<2x128xf32>
    %9 = vector.broadcast %3 : vector<1x128xf32> to vector<2x128xf32>
    %10 = arith.addf %9, %8 : vector<2x128xf32>
    %11 = arith.addf %10, %2 : vector<2x128xf32>
    %c0_9 = arith.constant 0 : index
    %c0_10 = arith.constant 0 : index
    %c0_11 = arith.constant 0 : index
    %12 = vector.load %arg1[%c0_9, %c0_10, %c0_11] : memref<2x8x128xf32, #tpu.memory_space<vmem>>, vector<2x8x128xf32>
    %13 = vector.shape_cast %12 : vector<2x8x128xf32> to vector<16x128xf32>
    %c0_12 = arith.constant 0 : index
    %c0_13 = arith.constant 0 : index
    %14 = vector.load %arg5[%c0_12, %c0_13] : memref<128x128xf32, #tpu.memory_space<vmem>>, vector<128x128xf32>
    %cst_14 = arith.constant dense<0.000000e+00> : vector<16x128xf32>
    %15 = tpu.matmul %13, %14, %cst_14 {dimension_numbers = #tpu.dot_dimension_numbers<[1], [0], [0], [1], [0, 0, 1, 1], [], []>} : vector<16x128xf32>, vector<128x128xf32>, vector<16x128xf32> -> vector<16x128xf32>
    %16 = vector.shape_cast %15 : vector<16x128xf32> to vector<2x8x128xf32>
    %17 = vector.shape_cast %11 : vector<2x128xf32> to vector<2x1x128xf32>
    %18 = vector.broadcast %17 : vector<2x1x128xf32> to vector<2x8x128xf32>
    %19 = arith.addf %16, %18 : vector<2x8x128xf32>
    %c0_15 = arith.constant 0 : index
    %c0_16 = arith.constant 0 : index
    %c0_17 = arith.constant 0 : index
    %20 = vector.load %arg4[%c0_15, %c0_16, %c0_17] : memref<2x8x1xf32, #tpu.memory_space<vmem>>, vector<2x8x1xf32>
    %21 = vector.broadcast %20 : vector<2x8x1xf32> to vector<2x8x128xf32>
    %22 = arith.mulf %19, %21 : vector<2x8x128xf32>
    %c0_18 = arith.constant 0 : index
    %c0_19 = arith.constant 0 : index
    %c0_20 = arith.constant 0 : index
    %23 = vector.load %arg9[%c0_18, %c0_19, %c0_20] : memref<2x8x128xf32, #tpu.memory_space<vmem>>, vector<2x8x128xf32>
    tpu.vector_store %arg9[%c0_18, %c0_19, %c0_20], %22 {strides = array<i32>} : memref<2x8x128xf32, #tpu.memory_space<vmem>>, vector<2x8x128xf32>,
    return
  }
  func.func @transform_0(%arg0: i32) -> (i32, i32, i32) {
    %c0_i32 = arith.constant 0 : i32
    %c0_i32_0 = arith.constant 0 : i32
    %c0_i32_1 = arith.constant 0 : i32
    return %arg0, %c0_i32, %c0_i32_0 : i32, i32, i32
  }
  func.func @transform_1(%arg0: i32) -> (i32, i32) {
    %c0_i32 = arith.constant 0 : i32
    %c0_i32_0 = arith.constant 0 : i32
    return %arg0, %c0_i32 : i32, i32
  }
  func.func @transform_2(%arg0: i32) -> (i32, i32) {
    %c0_i32 = arith.constant 0 : i32
    %c0_i32_0 = arith.constant 0 : i32
    return %arg0, %c0_i32 : i32, i32
  }
  func.func @transform_3(%arg0: i32) -> (i32, i32, i32) {
    %c0_i32 = arith.constant 0 : i32
    %c0_i32_0 = arith.constant 0 : i32
    %c0_i32_1 = arith.constant 0 : i32
    return %arg0, %c0_i32, %c0_i32_0 : i32, i32, i32
  }
  func.func @transform_4(%arg0: i32) -> (i32, i32) {
    %c0_i32 = arith.constant 0 : i32
    %c0_i32_0 = arith.constant 0 : i32
    %c0_i32_1 = arith.constant 0 : i32
    return %c0_i32, %c0_i32_0 : i32, i32
  }
  func.func @transform_5(%arg0: i32) -> (i32, i32) {
    %c0_i32 = arith.constant 0 : i32
    %c0_i32_0 = arith.constant 0 : i32
    %c0_i32_1 = arith.constant 0 : i32
    return %c0_i32, %c0_i32_0 : i32, i32
  }
  func.func @transform_6(%arg0: i32) -> (i32, i32) {
    %c0_i32 = arith.constant 0 : i32
    %c0_i32_0 = arith.constant 0 : i32
    %c0_i32_1 = arith.constant 0 : i32
    return %c0_i32, %c0_i32_0 : i32, i32
  }
  func.func @transform_7(%arg0: i32) -> (i32, i32) {
    %c0_i32 = arith.constant 0 : i32
    %c0_i32_0 = arith.constant 0 : i32
    %c0_i32_1 = arith.constant 0 : i32
    return %c0_i32, %c0_i32_0 : i32, i32
  }
  func.func @transform_8(%arg0: i32) -> (i32, i32, i32) {
    %c0_i32 = arith.constant 0 : i32
    %c0_i32_0 = arith.constant 0 : i32
    %c0_i32_1 = arith.constant 0 : i32
    return %arg0, %c0_i32, %c0_i32_0 : i32, i32, i32
  }
}

</mosaic_0001>

<bundles_post_ra>
// kernel: tpu_custom_call.1
= control target key start
LH: loop header
LB: loop body
LE: loop exit
PB: predicated region body
PF: predicated region fallthrough
CT: control target
= control target key end

     0   :  { %13 = vsyncpa [#allocation3], 0  ;;  %s662_s0 = inlined_call_operand.vmem [shape: f32[2,8,128], index: 0, kind: input, shape index: {}]   ;;  %s663_s1 = inlined_call_operand.vmem [shape: f32[2,1], index: 1, kind: input, shape index: {}]   ;;  %s664_s2 = inlined_call_operand.vmem [shape: f32[2,64], index: 2, kind: input, shape index: {}]   ;;  %s665_s3 = inlined_call_operand.vmem [shape: f32[2,8,1], index: 3, kind: input, shape index: {}]   ;;  %s666_s4 = inlined_call_operand.hbm [shape: f32[128,128], index: 4, kind: input, shape index: {}]   ;;  %s667_s5 = inlined_call_operand.vmem [shape: f32[1,128], index: 5, kind: input, shape index: {}]   ;;  %s668_s6 = inlined_call_operand.vmem [shape: f32[1,128], index: 6, kind: input, shape index: {}]   ;;  %s669_s7 = inlined_call_operand.hbm [shape: f32[64,128], index: 7, kind: input, shape index: {}]   ;;  %s670_s8 = inlined_call_operand.hbm [shape: f32[2,8,128], index: 8, kind: output, shape index: {}]  }
   0x1   :  { %14 = vsyncpa [#allocation6], 0 }
   0x2   :  { %15 = vsyncpa [#allocation4], 0  ;;  %s538_s27 = smov [#allocation2]   ;;  %s466_s9 = scalar_lea.hbm %s666_s4, 2048 }
   0x3   :  { %s29_s28 = sshll.u32 %s538_s27, 4  ;;  %p467_p0 = scmp.ne.s32.totalorder %s666_s4, %s466_s9  ;;  %s30_s28 = int_to_ptr.vmem [resolvable:$true] %s29_s28 }
   0x4   :  { %p470_p1 = scmp.lt.u32.totalorder %s466_s9, %s666_s4 }
   0x6   :  { %p472_p2 = pnand %p470_p1, %p467_p0 }
   0x8   :  { %475 = shalt.err (!%p472_p2)
}
   0x9   :  { %s476_s14 = scalar_lea.vmem %s30_s28, 2048  ;;  %p481_p4 = scmp.lt.s32.totalorder %s30_s28, %s30_s28 }
   0xa   :  { %p477_p3 = scmp.ne.s32.totalorder %s30_s28, %s476_s14  ;;  %p482_p5 = scmp.lt.s32.totalorder %s476_s14, %s476_s14 }
   0xc   :  { %p483_p6 = por %p482_p5, %p481_p4 }
   0xe   :  { %p484_p7 = pnand %p483_p6, %p477_p3 }
  0x10   :  { %487 = shalt.err (!%p484_p7)
}
  0x11   :  { %s539_s15 = smov 128   ;;  %s540_s16 = smov 8  }
  0x12   :  { %35 = dma.hbm_to_vmem [thread:$0]  %s666_s4, 2048, %s30_s28, [#allocation3], %s539_s15, %s539_s15, %s540_s16  }
  0x13   :  { %s541_s19 = smov [#allocation5]   ;;  %s488_s23 = scalar_lea.hbm %s669_s7, 1024 }
  0x14   :  { %s45_s20 = sshll.u32 %s541_s19, 4  ;;  %p489_p8 = scmp.ne.s32.totalorder %s669_s7, %s488_s23  ;;  %s46_s20 = int_to_ptr.vmem [resolvable:$true] %s45_s20 }
  0x15   :  { %p492_p9 = scmp.lt.u32.totalorder %s488_s23, %s669_s7 }
  0x17   :  { %p494_p10 = pnand %p492_p9, %p489_p8 }
  0x19   :  { %497 = shalt.err (!%p494_p10)
}
  0x1a   :  { %s498_s29 = scalar_lea.vmem %s46_s20, 1024  ;;  %p503_p12 = scmp.lt.s32.totalorder %s46_s20, %s46_s20 }
  0x1b   :  { %p499_p11 = scmp.ne.s32.totalorder %s46_s20, %s498_s29  ;;  %p504_p13 = scmp.lt.s32.totalorder %s498_s29, %s498_s29 }
  0x1d   :  { %p505_p0 = por %p504_p13, %p503_p12 }
  0x1f   :  { %p506_p1 = pnand %p505_p0, %p499_p11 }
  0x21   :  { %509 = shalt.err (!%p506_p1)
}
  0x22   :  { %51 = dma.hbm_to_vmem [thread:$0]  %s669_s7, 1024, %s46_s20, [#allocation6], %s539_s15, %s539_s15, %s540_s16  }
  0x23   :  { %532 = dma.done.wait [#allocation3], 2048  }
  0x24   :  { %533 = vsyncadd [#allocation3], 4294965248 }
  0x25   :  { %534 = dma.done.wait [#allocation6], 1024  }
  0x26   :  { %535 = vsyncadd [#allocation6], 4294966272  ;;  %v542_v0 = vmov 0.0|0.0   ;;  %vm543_vm0 = vmmov 0   ;;  %v544_v1 = vmov 0.0   ;;  %v545_v2 = vmov 0  }
  0x27   :  { %410 = vmatprep.subr.bf16.mxu0 %v542_v0  ;;  %372 = vmatprep.mubr.msk.f32.mxu0 %vm543_vm0, %v544_v1  ;;  %v166_v3 = vld [vmem:[#allocation2] sm:$0xff]  ;;  %v167_v4 = vld [vmem:[#allocation2 + $0x8] sm:$0xff]  ;;  %v168_v5 = vld [vmem:[#allocation2 + $0x10] sm:$0xff]  ;;  %vm67_vm1 = vcmask 523264   ;;  %v546_v46 = vmov 1966171168   ;;  %v261_v48 = vlaneseq }
  0x28   :  { %464 = vset.pattern.permute.xlu0 %v545_v2  ;;  %465 = vset.pattern.permute.xlu1 %v545_v2  ;;  %v422_v6 = vpack.c.bf16 %v167_v4, %v166_v3  ;;  %v169_v7 = vld [vmem:[#allocation2 + $0x18] sm:$0xff]  ;;  %v59_v8 = vld [vmem:[#allocation5] sm:$0xff]  ;;  %v60_v9 = vld [vmem:[#allocation5 + $0x8] sm:$0xff]  ;;  %v259_v47 = vunpack.c.l.s4 %v546_v46 }
  0x29   :  { %v426_v10 = vpack.c.bf16 %v169_v7, %v168_v5  ;;  %v411_v11 = vpack.c.bf16 %v60_v9, %v59_v8  ;;  %v170_v12 = vld [vmem:[#allocation2 + $0x20] sm:$0xff]  ;;  %v171_v13 = vld [vmem:[#allocation2 + $0x28] sm:$0xff]  ;;  %v61_v14 = vld [vmem:[#allocation5 + $0x10] sm:$0xff]  ;;  %v262_v53 = vshrl.u32 %v261_v48, 7 }
  0x2a   :  { %423 = vmatprep.subr.bf16.mxu1 %v422_v6  ;;  %v62_v15 = vld [vmem:[#allocation5 + $0x18] sm:$0xff]  ;;  %v430_v17 = vpack.c.bf16 %v171_v13, %v170_v12  ;;  %v63_v18 = vld [vmem:[#allocation5 + $0x20] sm:$0xff]  ;;  %v64_v19 = vld [vmem:[#allocation5 + $0x28] sm:$0xff]  ;;  %v260_v52 = vunpack.c.0.s8 %v259_v47 }
  0x2b   :  { %425 = vmatpush3.bf16.msra.mxu1 %v422_v6  ;;  %412 = vmatpush3.bf16.msra.mxu0 %v411_v11  ;;  %v414_v16 = vpack.c.bf16 %v62_v15, %v61_v14  ;;  %v172_v20 = vld [vmem:[#allocation2 + $0x30] sm:$0xff]  ;;  %v173_v21 = vld [vmem:[#allocation2 + $0x38] sm:$0xff]  ;;  %v417_v22 = vpack.c.bf16 %v64_v19, %v63_v18  ;;  %v164_v24 = vld [vmem:[%s662_s0] sm:$0xff]  ;;  %v282_v62 = vsub.s32 0, %v262_v53 }
  0x2c   :  { %427 = vmatprep.subr.bf16.mxu1 %v426_v10  ;;  %413 = vmatprep.subr.bf16.mxu0 %v542_v0  ;;  %v65_v23 = vld [vmem:[#allocation5 + $0x30] sm:$0xff]  ;;  %v434_v25 = vpack.c.bf16 %v173_v21, %v172_v20  ;;  %v66_v26 = vld [vmem:[#allocation5 + $0x38] sm:$0xff]  ;;  %v142_v27 = vld [vmem:[%s663_s1] sm:$0x3]  ;;  %v263_v55 = vsub.s32 %v260_v52, %v262_v53 }
  0x2d   :  { %v293_v28 = vld [vmem:[%s665_s3 + $0x8] sm:$0xff]  ;;  %v174_v29 = vld [vmem:[#allocation2 + $0x40] sm:$0xff]  ;;  %407 = vmatprep.mubr.f32.mxu1 %v164_v24  ;;  %146 = vperm.xlu0 %464, %v142_v27   ;;  %v420_v32 = vpack.c.bf16 %v66_v26, %v65_v23  ;;  %v176_v34 = vld [vmem:[#allocation2 + $0x50] sm:$0xff] }
  0x2e   :  { %v175_v30 = vld [vmem:[#allocation2 + $0x48] sm:$0xff]  ;;  %v292_v31 = vld [vmem:[%s665_s3] sm:$0xff]  ;;  %301 = vperm.xlu1 %465, %v293_v28   ;;  %v177_v35 = vld [vmem:[#allocation2 + $0x58] sm:$0xff] }
  0x2f   :  { %429 = vmatpush3.bf16.msra.mxu1 %v426_v10  ;;  %415 = vmatpush3.bf16.msra.mxu0 %v414_v16  ;;  %v438_v33 = vpack.c.bf16 %v175_v30, %v174_v29  ;;  %v58_v36 = vld [vmem:[%s664_s2] sm:$0x3]  ;;  %v442_v37 = vpack.c.bf16 %v177_v35, %v176_v34  ;;  %v179_v39 = vld [vmem:[#allocation2 + $0x68] sm:$0xff]  ;;  %v180_v41 = vld [vmem:[#allocation2 + $0x70] sm:$0xff] }
  0x30   :  { %431 = vmatprep.subr.bf16.mxu1 %v430_v17  ;;  %416 = vmatprep.subr.bf16.mxu0 %v542_v0  ;;  %v178_v38 = vld [vmem:[#allocation2 + $0x60] sm:$0xff]  ;;  %v181_v42 = vld [vmem:[#allocation2 + $0x78] sm:$0xff]  ;;  %v165_v44 = vld [vmem:[%s662_s0 + $0x8] sm:$0xff]  ;;  %s547_s0 = smov [#allocation7]  }
  0x31   :  { %296 = vperm.xlu0 %464, %v292_v31   ;;  %v446_v40 = vpack.c.bf16 %v179_v39, %v178_v38  ;;  %v450_v43 = vpack.c.bf16 %v181_v42, %v180_v41  ;;  %v327_v45 = vld [vmem:[%s668_s6] ss:$0 sm:$0xff] }
  0x32   :  { %v328_v51 = vld [vmem:[%s667_s5] ss:$0 sm:$0xff]  ;;  %s313_s5 = sshll.u32 %s547_s0, 4  ;;  %s314_s5 = int_to_ptr.vmem [resolvable:$true] %s313_s5 }
  0x33   :  { %433 = vmatpush3.bf16.msra.mxu1 %v430_v17  ;;  %418 = vmatpush3.bf16.msra.mxu0 %v417_v22  ;;  %s510_s6 = scalar_lea.vmem %s314_s5, 256  ;;  %p515_p3 = scmp.lt.s32.totalorder %s314_s5, %s314_s5 }
  0x34   :  { %435 = vmatprep.subr.bf16.mxu1 %v434_v25  ;;  %419 = vmatprep.subr.bf16.mxu0 %v542_v0  ;;  %p511_p2 = scmp.ne.s32.totalorder %s314_s5, %s510_s6  ;;  %p516_p4 = scmp.lt.s32.totalorder %s510_s6, %s510_s6 }
  0x36   :  { %p517_p5 = por %p516_p4, %p515_p3 }
  0x37   :  { %437 = vmatpush3.bf16.msra.mxu1 %v434_v25  ;;  %421 = vmatpush3.bf16.msra.mxu0 %v420_v32 }
  0x38   :  { %439 = vmatprep.subr.bf16.mxu1 %v438_v33  ;;  %p518_p6 = pnand %p517_p5, %p511_p2 }
  0x3a   :  { %373 = vmatmul.mubr.msk.f32.vlgmr.msra.gmra.mrb[0].mxu0 %vm67_vm1, %v58_v36 }
  0x3b   :  { %441 = vmatpush3.bf16.msra.mxu1 %v438_v33 }
  0x3c   :  { %443 = vmatprep.subr.bf16.mxu1 %v442_v37 }
  0x3f   :  { %445 = vmatpush3.bf16.msra.mxu1 %v442_v37 }
  0x40   :  { %447 = vmatprep.subr.bf16.mxu1 %v446_v40 }
  0x43   :  { %449 = vmatpush3.bf16.msra.mxu1 %v446_v40 }
  0x44   :  { %451 = vmatprep.subr.bf16.mxu1 %v450_v43 }
  0x47   :  { %453 = vmatpush3.bf16.msra.mxu1 %v450_v43 }
  0x4a   :  { %408 = vmatmul.mubr.f32.vlgmr.msra.gmra.mrb[0].mxu1 %v165_v44 }
  0xac   :  { %v147_v49 = vpop.permute.xlu0 %146 }
  0xad   :  { %v155_v50 = vmul.f32 %v327_v45, %v147_v49  ;;  %v302_v3 = vpop.permute.xlu1 %301 }
  0xaf   :  { %v162_v54 = vadd.f32 %v328_v51, %v155_v50 }
  0xb0   :  { %v297_v7 = vpop.permute.xlu0 %296 }
 0x10d   :  { %v137_v56 = vpop.f32.mrb[0].mxu0 }
 0x10e   :  { %v163_v57 = vadd.f32 %v162_v54, %v137_v56  ;;  %v374_v58 = vpop.f32.mrb[1].mxu0 }
 0x110   :  { %v264_v59 = vrot.slane %v163_v57, %v263_v55 }
 0x112   :  { %v265_v60 = vcombine.high %v264_v59, %v264_v59  ;;  %v272_v63 = vrot.slane %v264_v59, %v263_v55 }
 0x114   :  { %v279_v61 = vrot.slane %v265_v60, %v263_v55  ;;  %v283_v2 = vrot.slane %v272_v63, %v282_v62 }
 0x116   :  { %v287_v0 = vrot.slane %v279_v61, %v282_v62 }
 0x11d   :  { %v409_v1 = vpop.f32.mrb[0].mxu1 }
 0x11e   :  { %v291_v4 = vadd.f32 %v409_v1, %v287_v0  ;;  %v248_v5 = vpop.f32.mrb[1].mxu1 }
 0x11f   :  { %v290_v6 = vadd.f32 %v283_v2, %v248_v5 }
 0x120   :  { %v305_v8 = vmul.f32 %v302_v3, %v291_v4 }
 0x121   :  { %v304_v9 = vmul.f32 %v297_v7, %v290_v6 }
 0x122   :  { %307 = vst [vmem:[#allocation7 + $0x8] sm:$0xff] %v305_v8 }
 0x123   :  { %306 = vst [vmem:[#allocation7] sm:$0xff] %v304_v9 }
 0x124   :  { %521 = shalt.err (!%p518_p6)
}
 0x125   :  { %s522_s24 = scalar_lea.hbm %s670_s8, 256 }
 0x126   :  { %p523_p7 = scmp.ne.s32.totalorder %s670_s8, %s522_s24  ;;  %p526_p8 = scmp.lt.u32.totalorder %s522_s24, %s670_s8 }
 0x128   :  { %p528_p9 = pnand %p526_p8, %p523_p7 }
 0x12a   :  { %531 = shalt.err (!%p528_p9)
}
 0x12b   :  { %319 = dma.vmem_to_hbm [thread:$0]  %s314_s5, 256, %s670_s8, [#allocation4], %s539_s15, %s539_s15, %s540_s16  }
 0x12c   :  { %536 = dma.done.wait [#allocation4], 256  }
 0x12d   :  { %537 = vsyncadd [#allocation4], 4294967040 }
 0x12e   :  { %323 = vsyncpa [#allocation3], 1 }
 0x12f   :  { %324 = vsyncpa [#allocation6], 1 }
 0x130   :  { %325 = vsyncpa [#allocation4], 1 }

</bundles_post_ra>
